<compile_context>
chip_gen: v7x
topology: tpu7x:2x2x1
jax: 0.10.0
libtpu: 0.0.40
codegen_flags: <defaults>
</compile_context>

<pallas_src>
import functools

import jax
import jax.numpy as jnp
from jax.experimental import pallas as pl
from jax.experimental.pallas import tpu as pltpu


# --------------------------------------------------------------------------
# Kernel
# --------------------------------------------------------------------------
def _slot_sampler_kernel(x_ref, slots_ref, out_ref, m_ref, d_ref, acc_ref, *,
                         mm_dtype):
    # x_ref:     (Bb, Tt, F)  batch block x sequence tile (input dtype)
    # slots_ref: (F, S)       grid-invariant, already cast to mm_dtype
    # out_ref:   (Bb, F, S)   written once, on the last sequence tile
    # m_ref/d_ref: (Bb, 1, S) running max / denom (f32 scratch)
    # acc_ref:   (Bb, F, S)   running unnormalized result (f32 scratch)
    t = pl.program_id(1)
    nt = pl.num_programs(1)

    @pl.when(t == 0)
    def _init():
        m_ref[...] = jnp.full(m_ref.shape, -jnp.inf, dtype=m_ref.dtype)
        d_ref[...] = jnp.zeros(d_ref.shape, d_ref.dtype)
        acc_ref[...] = jnp.zeros(acc_ref.shape, acc_ref.dtype)

    Bb, Tt, F = x_ref.shape
    S = slots_ref.shape[1]

    x = x_ref[...]                                     # (Bb, Tt, F), input dtype
    slots = slots_ref[...]                             # (F, S), mm_dtype

    # Logits for the whole block in one MXU pass: (Bb*Tt, F) @ (F, S).
    # Reshape the input-dtype x first (layout-preserving for Tt % 8 == 0),
    # then cast to the matmul dtype.
    logits = jnp.dot(
        x.reshape(Bb * Tt, F).astype(mm_dtype), slots,
        preferred_element_type=jnp.float32,
    ).reshape(Bb, Tt, S)                               # (Bb, Tt, S) f32

    # Online softmax over the sequence axis (torch dim=1), f32 statistics.
    m_prev = m_ref[...]                                           # (Bb, 1, S)
    m_new = jnp.maximum(m_prev, jnp.max(logits, axis=1, keepdims=True))
    alpha = jnp.exp(m_prev - m_new)                               # (Bb, 1, S)
    p = jnp.exp(logits - m_new)                                   # (Bb, Tt, S)
    d_ref[...] = alpha * d_ref[...] + jnp.sum(p, axis=1, keepdims=True)

    # Unnormalized accumulation: acc[b,f,s] += sum_t x[b,t,f] * p[b,t,s].
    # (Second contraction expressed directly as a batched dot_general; note
    # with tiny S this is MXU-underutilized but the kernel is memory-bound.)
    upd = jax.lax.dot_general(
        x.astype(mm_dtype), p.astype(mm_dtype),
        dimension_numbers=(((1,), (1,)), ((0,), (0,))),
        preferred_element_type=jnp.float32,
    )                                                             # (Bb, F, S)
    acc_ref[...] = alpha * acc_ref[...] + upd
    m_ref[...] = m_new

    @pl.when(t == nt - 1)
    def _finalize():
        # Normalize AFTER the T-contraction (softmax scale commutes with it):
        # one (Bb,1,S)-broadcast multiply instead of a (Bb,T,S) pass.
        inv = pl.reciprocal(d_ref[...], approx=True)              # (Bb, 1, S)
        out_ref[...] = (acc_ref[...] * inv).astype(out_ref.dtype)


# --------------------------------------------------------------------------
# Block-size / VMEM helpers (generation- and padding-aware)
# --------------------------------------------------------------------------
def _round_up(v, m):
    return -(-v // m) * m


def _tpu_vmem_and_cores():
    """Physical VMEM bytes and TensorCore count; conservative fallbacks."""
    vmem = 64 * 1024 * 1024          # v7x-safe fallback
    cores = 1
    try:
        info = pltpu.get_tpu_info()
        vmem = int(info.vmem_capacity_bytes)
        for attr in ("num_cores", "core_count", "num_tensorcores"):
            v = getattr(info, attr, None)
            if isinstance(v, int) and v > 0:
                cores = v
                break
    except Exception:
        pass
    return vmem, cores


def _per_batch_vmem_bytes(t_blk, F, S, x_bytes, mm_bytes, out_bytes):
    """Padded per-batch-element VMEM footprint (lanes->128, sublanes->8/16)."""
    Fl = _round_up(F, 128)           # F in lanes
    Sl = _round_up(S, 128)           # S in lanes
    Ts = _round_up(t_blk, 16)        # T in sublanes (worst-case bf16 packing)
    Fs = _round_up(F, 16)            # F in sublanes
    return (
        2 * Ts * Fl * x_bytes                 # double-buffered x input block
        + 2 * Fs * Sl * out_bytes             # double-buffered (Bb,F,S) out block
        + Ts * Fl * (x_bytes + 2 * mm_bytes)  # in-kernel x value + mm-dtype casts
        + Ts * Sl * (4 + 4 + mm_bytes)        # logits, p (f32), p in mm dtype
        + Fs * Sl * (4 + 4)                   # acc scratch + update value (f32)
        + 2 * 8 * Sl * 4                      # m, d scratch (8-sublane padded)
    )


def _pick_seq_block(T, fits):
    """Largest divisor of T that is a multiple of 8 and fits VMEM; T if OK."""
    if fits(T):
        return T
    divs = [d for d in range(8, T, 8) if T % d == 0]
    for d in reversed(divs):
        if fits(d):
            return d
    return divs[0] if divs else T


def _largest_divisor_leq(n, cap):
    cap = max(1, min(cap, n))
    for d in range(cap, 0, -1):
        if n % d == 0:
            return d
    return 1


# --------------------------------------------------------------------------
# Wrapper
# --------------------------------------------------------------------------
def slot_sampler(x, slots, *, batch_block=None, seq_block=None,
                 compute_dtype="auto"):
    """Pallas implementation of SlotSampler.forward.

    Args:
      x:     (B, T, F) array.
      slots: (F, S) array (the nn.Parameter).
      batch_block / seq_block: optional tile overrides (auto-picked if None).
      compute_dtype: "auto" (bf16 for f32 inputs), None (input dtype), or a dtype.
        Matmul inputs use this dtype; accumulation and softmax stay f32.
    Returns:
      (res, 0.0) with res of shape (B, S, F).
    """
    B, T, F = x.shape
    F2, S = slots.shape
    assert F == F2, "feature dims must match"

    if isinstance(compute_dtype, str) and compute_dtype == "auto":
        mm_dtype = jnp.bfloat16 if x.dtype == jnp.float32 else x.dtype
    elif compute_dtype is None:
        mm_dtype = x.dtype
    else:
        mm_dtype = compute_dtype
    slots_mm = slots.astype(mm_dtype)      # cast once here, not per grid step

    x_b = jnp.dtype(x.dtype).itemsize
    mm_b = jnp.dtype(mm_dtype).itemsize
    out_b = x_b

    vmem_bytes, num_cores = _tpu_vmem_and_cores()
    budget = int(vmem_bytes * 0.45)        # blocks + scratch + intermediates

    fits = lambda tb: _per_batch_vmem_bytes(tb, F, S, x_b, mm_b, out_b) <= budget
    if seq_block is None:
        seq_block = _pick_seq_block(T, fits)
    seq_block = max(1, min(seq_block, T))
    if T % seq_block != 0:
        seq_block = T                      # partial T tiles would corrupt softmax sums
    grid_t = T // seq_block

    if batch_block is None:
        per_b = _per_batch_vmem_bytes(seq_block, F, S, x_b, mm_b, out_b)
        slots_bytes = 2 * _round_up(F, 16) * _round_up(S, 128) * mm_b
        bb = max(1, (budget - slots_bytes) // per_b)
        target_grid_b = 1
        if grid_t == 1:
            target_grid_b = 4              # a few steps so the pipeline can overlap
        if num_cores > 1:
            target_grid_b = max(target_grid_b, 2 * num_cores)   # megacore sharding
        if B >= target_grid_b:
            bb = min(bb, B // target_grid_b)
        batch_block = bb
    Bb = _largest_divisor_leq(B, batch_block)   # Bb | B: no padded tail block
    grid_b = B // Bb

    kernel = functools.partial(_slot_sampler_kernel, mm_dtype=mm_dtype)

    res_fs = pl.pallas_call(
        kernel,
        out_shape=jax.ShapeDtypeStruct((B, F, S), x.dtype),
        grid_spec=pltpu.PrefetchScalarGridSpec(
            num_scalar_prefetch=0,
            grid=(grid_b, grid_t),
            in_specs=[
                # x: one (Bb, seq_block, F) tile; seq_block is a multiple of 8
                # or the full T, F is the full feature dim -> (8,128) rule OK.
                pl.BlockSpec((Bb, seq_block, F), lambda b, t: (b, t, 0)),
                # slots: grid-invariant.
                pl.BlockSpec((F, S), lambda b, t: (0, 0)),
            ],
            # Output block constant across the T axis (accumulator pattern).
            out_specs=pl.BlockSpec((Bb, F, S), lambda b, t: (b, 0, 0)),
            scratch_shapes=[
                pltpu.VMEM((Bb, 1, S), jnp.float32),   # running max
                pltpu.VMEM((Bb, 1, S), jnp.float32),   # running denom
                pltpu.VMEM((Bb, F, S), jnp.float32),   # running accumulator
            ],
        ),
        compiler_params=pltpu.CompilerParams(
            dimension_semantics=("parallel", "arbitrary"),
            vmem_limit_bytes=min(int(vmem_bytes * 0.75), 112 * 1024 * 1024),
        ),
    )(x, slots_mm)

    # Final permute back to (B, S, F) done by XLA on the (small) output slab.
    res = jnp.transpose(res_fs, (0, 2, 1))
    return res, 0.0


# --------------------------------------------------------------------------
# Reference + self-test
# --------------------------------------------------------------------------
def _reference(x, slots):
    logits = jnp.einsum("btf,fs->bts", x, slots)
    probs = jax.nn.softmax(logits, axis=1)             # softmax over T (torch dim=1)
    return jnp.einsum("btf,bts->bsf", x, probs)        # (B, S, F)


if __name__ == "__main__":
    key = jax.random.PRNGKey(0)
    kx, kslots, kx2 = jax.random.split(key, 3)

    # Shapes consistent with the module: batch=2, seq=8, feature=32, slots=8.
    B, T, F, S = 2, 8, 32, 8
    x = jax.random.normal(kx, (B, T, F), dtype=jnp.float32)
    slots = jax.random.normal(kslots, (F, S), dtype=jnp.float32)  # nn.Parameter

    # 1) Default path: bf16 matmuls, single sequence tile.
    res, aux = slot_sampler(x, slots)
    res = jax.block_until_ready(res)
    assert res.shape == (B, S, F)
    assert aux == 0.0
    # Compare against a reference with bf16-quantized inputs (kernel accumulates
    # in f32); remaining slack covers the bf16 probs cast + approx reciprocal.
    xq = x.astype(jnp.bfloat16).astype(jnp.float32)
    sq = slots.astype(jnp.bfloat16).astype(jnp.float32)
    ref_bf16 = _reference(xq, sq)
    assert jnp.allclose(res, ref_bf16, atol=3e-2, rtol=3e-2), "bf16 path mismatch"

    # 2) Tiled online-softmax path (grid over T), f32 matmuls for tight parity.
    T2 = 16
    x2 = jax.random.normal(kx2, (B, T2, F), dtype=jnp.float32)
    res2, _ = slot_sampler(x2, slots, seq_block=8, compute_dtype=jnp.float32)
    res2 = jax.block_until_ready(res2)
    ref2 = _reference(x2, slots)
    assert res2.shape == (B, S, F)
    assert jnp.allclose(res2, ref2, atol=5e-3, rtol=5e-3), "tiled path mismatch"

    print("KERNEL_OK")
</pallas_src>

<mosaic_0001>
module attributes {stable_mosaic.version = 11 : i64} {
  func.func @_slot_sampler_kernel(%arg0: i32, %arg1: i32, %arg2: memref<2x8x32xf32, #tpu.memory_space<vmem>>, %arg3: memref<32x8xbf16, #tpu.memory_space<vmem>>, %arg4: memref<2x32x8xf32, #tpu.memory_space<vmem>>, %arg5: memref<2x1x8xf32, #tpu.memory_space<vmem>>, %arg6: memref<2x1x8xf32, #tpu.memory_space<vmem>>, %arg7: memref<2x32x8xf32, #tpu.memory_space<vmem>>) attributes {dimension_semantics = [#tpu.dimension_semantics<parallel>, #tpu.dimension_semantics<arbitrary>], iteration_bounds = array<i64: 1, 1>, scalar_prefetch = 0 : i64, scratch_operands = 3 : i64, tpu.core_type = #tpu.core_type<tc>, window_params = [{transform_indices = @transform_0, window_bounds = array<i64: 2, 8, 32>}, {pipeline_mode = #tpu.pipeline_mode<synchronous>, transform_indices = @transform_1, window_bounds = array<i64: 32, 8>}, {transform_indices = @transform_2, window_bounds = array<i64: 2, 32, 8>}]} {
    %c0_i32 = arith.constant 0 : i32
    %0 = arith.cmpi eq, %arg1, %c0_i32 : i32
    %1 = arith.extui %0 : i1 to i32
    %c0_i32_0 = arith.constant 0 : i32
    %2 = arith.cmpi ne, %1, %c0_i32_0 : i32
    scf.if %2 {
      %cst_28 = arith.constant 0xFF800000 : f32
      %36 = vector.broadcast %cst_28 : f32 to vector<2x1x8xf32>
      %c0_29 = arith.constant 0 : index
      %c0_30 = arith.constant 0 : index
      %c0_31 = arith.constant 0 : index
      %37 = vector.load %arg5[%c0_29, %c0_30, %c0_31] : memref<2x1x8xf32, #tpu.memory_space<vmem>>, vector<2x1x8xf32>
      tpu.vector_store %arg5[%c0_29, %c0_30, %c0_31], %36 {strides = array<i32>} : memref<2x1x8xf32, #tpu.memory_space<vmem>>, vector<2x1x8xf32>,
      %cst_32 = arith.constant 0.000000e+00 : f32
      %38 = vector.broadcast %cst_32 : f32 to vector<2x1x8xf32>
      %c0_33 = arith.constant 0 : index
      %c0_34 = arith.constant 0 : index
      %c0_35 = arith.constant 0 : index
      %39 = vector.load %arg6[%c0_33, %c0_34, %c0_35] : memref<2x1x8xf32, #tpu.memory_space<vmem>>, vector<2x1x8xf32>
      tpu.vector_store %arg6[%c0_33, %c0_34, %c0_35], %38 {strides = array<i32>} : memref<2x1x8xf32, #tpu.memory_space<vmem>>, vector<2x1x8xf32>,
      %cst_36 = arith.constant 0.000000e+00 : f32
      %40 = vector.broadcast %cst_36 : f32 to vector<2x32x8xf32>
      %c0_37 = arith.constant 0 : index
      %c0_38 = arith.constant 0 : index
      %c0_39 = arith.constant 0 : index
      %41 = vector.load %arg7[%c0_37, %c0_38, %c0_39] : memref<2x32x8xf32, #tpu.memory_space<vmem>>, vector<2x32x8xf32>
      tpu.vector_store %arg7[%c0_37, %c0_38, %c0_39], %40 {strides = array<i32>} : memref<2x32x8xf32, #tpu.memory_space<vmem>>, vector<2x32x8xf32>,
    } else {
    }
    %c0 = arith.constant 0 : index
    %c0_1 = arith.constant 0 : index
    %c0_2 = arith.constant 0 : index
    %3 = vector.load %arg2[%c0, %c0_1, %c0_2] : memref<2x8x32xf32, #tpu.memory_space<vmem>>, vector<2x8x32xf32>
    %c0_3 = arith.constant 0 : index
    %c0_4 = arith.constant 0 : index
    %4 = vector.load %arg3[%c0_3, %c0_4] : memref<32x8xbf16, #tpu.memory_space<vmem>>, vector<32x8xbf16>
    %5 = vector.shape_cast %3 : vector<2x8x32xf32> to vector<16x32xf32>
    %6 = arith.truncf %5 : vector<16x32xf32> to vector<16x32xbf16>
    %cst = arith.constant dense<0.000000e+00> : vector<16x8xf32>
    %7 = tpu.matmul %6, %4, %cst {dimension_numbers = #tpu.dot_dimension_numbers<[1], [0], [0], [1], [0, 0, 1, 1], [], []>} : vector<16x32xbf16>, vector<32x8xbf16>, vector<16x8xf32> -> vector<16x8xf32>
    %8 = vector.shape_cast %7 : vector<16x8xf32> to vector<2x8x8xf32>
    %c0_5 = arith.constant 0 : index
    %c0_6 = arith.constant 0 : index
    %c0_7 = arith.constant 0 : index
    %9 = vector.load %arg5[%c0_5, %c0_6, %c0_7] : memref<2x1x8xf32, #tpu.memory_space<vmem>>, vector<2x1x8xf32>
    %cst_8 = arith.constant dense<0xFF800000> : vector<2x8xf32>
    %10 = vector.multi_reduction <maximumf>, %8, %cst_8 [1] : vector<2x8x8xf32> to vector<2x8xf32>
    %11 = vector.shape_cast %10 : vector<2x8xf32> to vector<2x1x8xf32>
    %12 = arith.maximumf %9, %11 : vector<2x1x8xf32>
    %13 = arith.subf %9, %12 : vector<2x1x8xf32>
    %14 = math.exp %13 : vector<2x1x8xf32>
    %15 = vector.broadcast %12 : vector<2x1x8xf32> to vector<2x8x8xf32>
    %16 = arith.subf %8, %15 : vector<2x8x8xf32>
    %17 = math.exp %16 : vector<2x8x8xf32>
    %c0_9 = arith.constant 0 : index
    %c0_10 = arith.constant 0 : index
    %c0_11 = arith.constant 0 : index
    %18 = vector.load %arg6[%c0_9, %c0_10, %c0_11] : memref<2x1x8xf32, #tpu.memory_space<vmem>>, vector<2x1x8xf32>
    %19 = arith.mulf %14, %18 : vector<2x1x8xf32>
    %cst_12 = arith.constant dense<0.000000e+00> : vector<2x8xf32>
    %20 = vector.multi_reduction <add>, %17, %cst_12 [1] : vector<2x8x8xf32> to vector<2x8xf32>
    %21 = vector.shape_cast %20 : vector<2x8xf32> to vector<2x1x8xf32>
    %22 = arith.addf %19, %21 : vector<2x1x8xf32>
    %c0_13 = arith.constant 0 : index
    %c0_14 = arith.constant 0 : index
    %c0_15 = arith.constant 0 : index
    %23 = vector.load %arg6[%c0_13, %c0_14, %c0_15] : memref<2x1x8xf32, #tpu.memory_space<vmem>>, vector<2x1x8xf32>
    tpu.vector_store %arg6[%c0_13, %c0_14, %c0_15], %22 {strides = array<i32>} : memref<2x1x8xf32, #tpu.memory_space<vmem>>, vector<2x1x8xf32>,
    %24 = arith.truncf %3 : vector<2x8x32xf32> to vector<2x8x32xbf16>
    %25 = arith.truncf %17 : vector<2x8x8xf32> to vector<2x8x8xbf16>
    %cst_16 = arith.constant dense<0.000000e+00> : vector<2x32x8xf32>
    %26 = tpu.matmul %24, %25, %cst_16 {dimension_numbers = #tpu.dot_dimension_numbers<[1], [1], [2], [2], [0, 0, 0, 2, 1, 2], [0], [0]>} : vector<2x8x32xbf16>, vector<2x8x8xbf16>, vector<2x32x8xf32> -> vector<2x32x8xf32>
    %c0_17 = arith.constant 0 : index
    %c0_18 = arith.constant 0 : index
    %c0_19 = arith.constant 0 : index
    %27 = vector.load %arg7[%c0_17, %c0_18, %c0_19] : memref<2x32x8xf32, #tpu.memory_space<vmem>>, vector<2x32x8xf32>
    %28 = vector.broadcast %14 : vector<2x1x8xf32> to vector<2x32x8xf32>
    %29 = arith.mulf %28, %27 : vector<2x32x8xf32>
    %30 = arith.addf %29, %26 : vector<2x32x8xf32>
    %c0_20 = arith.constant 0 : index
    %c0_21 = arith.constant 0 : index
    %c0_22 = arith.constant 0 : index
    %31 = vector.load %arg7[%c0_20, %c0_21, %c0_22] : memref<2x32x8xf32, #tpu.memory_space<vmem>>, vector<2x32x8xf32>
    tpu.vector_store %arg7[%c0_20, %c0_21, %c0_22], %30 {strides = array<i32>} : memref<2x32x8xf32, #tpu.memory_space<vmem>>, vector<2x32x8xf32>,
    %c0_23 = arith.constant 0 : index
    %c0_24 = arith.constant 0 : index
    %c0_25 = arith.constant 0 : index
    %32 = vector.load %arg5[%c0_23, %c0_24, %c0_25] : memref<2x1x8xf32, #tpu.memory_space<vmem>>, vector<2x1x8xf32>
    tpu.vector_store %arg5[%c0_23, %c0_24, %c0_25], %12 {strides = array<i32>} : memref<2x1x8xf32, #tpu.memory_space<vmem>>, vector<2x1x8xf32>,
    %c0_i32_26 = arith.constant 0 : i32
    %33 = arith.cmpi eq, %arg1, %c0_i32_26 : i32
    %34 = arith.extui %33 : i1 to i32
    %c0_i32_27 = arith.constant 0 : i32
    %35 = arith.cmpi ne, %34, %c0_i32_27 : i32
    scf.if %35 {
      %c0_28 = arith.constant 0 : index
      %c0_29 = arith.constant 0 : index
      %c0_30 = arith.constant 0 : index
      %36 = vector.load %arg6[%c0_28, %c0_29, %c0_30] : memref<2x1x8xf32, #tpu.memory_space<vmem>>, vector<2x1x8xf32>
      %37 = tpu.reciprocal %36 {approx = true} : vector<2x1x8xf32> -> vector<2x1x8xf32>
      %c0_31 = arith.constant 0 : index
      %c0_32 = arith.constant 0 : index
      %c0_33 = arith.constant 0 : index
      %38 = vector.load %arg7[%c0_31, %c0_32, %c0_33] : memref<2x32x8xf32, #tpu.memory_space<vmem>>, vector<2x32x8xf32>
      %39 = vector.broadcast %37 : vector<2x1x8xf32> to vector<2x32x8xf32>
      %40 = arith.mulf %38, %39 : vector<2x32x8xf32>
      %c0_34 = arith.constant 0 : index
      %c0_35 = arith.constant 0 : index
      %c0_36 = arith.constant 0 : index
      %41 = vector.load %arg4[%c0_34, %c0_35, %c0_36] : memref<2x32x8xf32, #tpu.memory_space<vmem>>, vector<2x32x8xf32>
      tpu.vector_store %arg4[%c0_34, %c0_35, %c0_36], %40 {strides = array<i32>} : memref<2x32x8xf32, #tpu.memory_space<vmem>>, vector<2x32x8xf32>,
    } else {
    }
    return
  }
  func.func @transform_0(%arg0: i32, %arg1: i32) -> (i32, i32, i32) {
    %c0_i32 = arith.constant 0 : i32
    %c0_i32_0 = arith.constant 0 : i32
    return %arg0, %arg1, %c0_i32 : i32, i32, i32
  }
  func.func @transform_1(%arg0: i32, %arg1: i32) -> (i32, i32) {
    %c0_i32 = arith.constant 0 : i32
    %c0_i32_0 = arith.constant 0 : i32
    %c0_i32_1 = arith.constant 0 : i32
    return %c0_i32, %c0_i32_0 : i32, i32
  }
  func.func @transform_2(%arg0: i32, %arg1: i32) -> (i32, i32, i32) {
    %c0_i32 = arith.constant 0 : i32
    %c0_i32_0 = arith.constant 0 : i32
    %c0_i32_1 = arith.constant 0 : i32
    return %arg0, %c0_i32, %c0_i32_0 : i32, i32, i32
  }
}

</mosaic_0001>

<bundles_post_ra>
// kernel: tpu_custom_call.1
= control target key start
LH: loop header
LB: loop body
LE: loop exit
PB: predicated region body
PF: predicated region fallthrough
CT: control target
= control target key end

     0   :  { %vm16_vm0 = vcmask 57344   ;;  %v462_v0 = vmov 0.0   ;;  %vm463_vm1 = vmmov 0   ;;  %v464_v2 = vmov -inf   ;;  %s574_s1 = inlined_call_operand.vmem [shape: bf16[32,8], index: 1, kind: input, shape index: {}]   ;;  %s575_s0 = inlined_call_operand.vmem [shape: f32[2,8,32], index: 0, kind: input, shape index: {}]   ;;  %s576_s2 = inlined_call_operand.vmem [shape: f32[2,32,8], index: 2, kind: output, shape index: {}]  }
   0x1   :  { %422 = vmatprep.subr.bf16.mxu0 %v462_v0  ;;  %v448_v1 = vld [vmem:[%s574_s1] sm:$0xff]   ;;  %426 = vmatprep.mubr.msk.bf16.mxu0 %vm463_vm1, %v462_v0  ;;  %19 = vst.msk [vmem:[#allocation3] sm:$0x1] %vm16_vm0, %v462_v0  ;;  %20 = vst.msk [vmem:[#allocation3 + $0x1] sm:$0x1] %vm16_vm0, %v462_v0  ;;  %vm21_vm2 = vcmask 64512   ;;  %v121_v18 = vlaneseq }
   0x2   :  { %17 = vst.msk [vmem:[#allocation2] sm:$0x1] %vm16_vm0, %v464_v2  ;;  %18 = vst.msk [vmem:[#allocation2 + $0x1] sm:$0x1] %vm16_vm0, %v464_v2  ;;  %423 = vmatpush3.bf16.msra.mxu0 %v448_v1  ;;  %v449_v3 = vld [vmem:[%s574_s1 + $0x8] sm:$0xff]   ;;  %v30_v4 = vld [vmem:[%s575_s0] sm:$0xff] }
   0x3   :  { %v31_v5 = vld [vmem:[%s575_s0 + $0x8] sm:$0xff]  ;;  %22 = vst.msk [vmem:[#allocation4] sm:$0xff] %vm21_vm2, %v462_v0  ;;  %23 = vst.msk [vmem:[#allocation4 + $0x8] sm:$0xff] %vm21_vm2, %v462_v0  ;;  %424 = vmatprep.subr.bf16.mxu0 %v462_v0  ;;  %v160_v6 = vpack.c.bf16 %v30_v4, %v30_v4  ;;  %vm49_vm3 = vcmask 261120   ;;  %v122_v23 = vshrl.u32 %v121_v18, 7  ;;  %vm186_vm4 = vcmask 1043456  }
   0x4   :  { %24 = vst.msk [vmem:[#allocation4 + $0x10] sm:$0xff] %vm21_vm2, %v462_v0  ;;  %25 = vst.msk [vmem:[#allocation4 + $0x18] sm:$0xff] %vm21_vm2, %v462_v0  ;;  %v36_v7 = vpack.c.bf16 %v31_v5, %v30_v4  ;;  %v161_v8 = vpack.c.bf16 %v31_v5, %v31_v5 }
   0x5   :  { %26 = vst.msk [vmem:[#allocation4 + $0x20] sm:$0xff] %vm21_vm2, %v462_v0  ;;  %27 = vst.msk [vmem:[#allocation4 + $0x28] sm:$0xff] %vm21_vm2, %v462_v0  ;;  %164 = vxpose.xlu0.c.b16.start.end [1/1] (short) (narrow) %v160_v6, 32  ;;  %v507_v29 = vsub.s32 0, %v122_v23 }
   0x6   :  { %28 = vst.msk [vmem:[#allocation4 + $0x30] sm:$0xff] %vm21_vm2, %v462_v0  ;;  %29 = vst.msk [vmem:[#allocation4 + $0x38] sm:$0xff] %vm21_vm2, %v462_v0  ;;  %425 = vmatpush3.bf16.msra.mxu0 %v449_v3 }
   0x8   :  { %v137_v2 = vld [vmem:[#allocation3] sm:$0x1]  ;;  %v138_v5 = vld [vmem:[#allocation3 + $0x1] sm:$0x1] }
   0x9   :  { %427 = vmatmul.mubr.msk.bf16.vlgmr.msra.gmra.mrb[0].mxu0 %vm49_vm3, %v36_v7  ;;  %v94_v27 = vld [vmem:[#allocation2] sm:$0x1]  ;;  %v95_v31 = vld [vmem:[#allocation2 + $0x1] sm:$0x1] }
   0xa   :  { %239 = vxpose.xlu0.c.b16.start.end [1/1] (short) (narrow) %v161_v8, 32 }
  0x6b   :  { %v172_v9 = vpop.trf.xlu0 }
  0x6c   :  { %432 = vmatprep.mubr.msk.bf16.mxu1 %vm21_vm2, %v172_v9 }
  0x6f   :  { %v173_v46 = vpop.trf.xlu0 }
  0x73   :  { %v247_v60 = vpop.trf.xlu0 }
  0x77   :  { %v248_v9 = vpop.trf.xlu0 }
  0xdc   :  { %v87_v10 = vpop.f32.mrb[0].mxu0 }
  0xdd   :  { %v97_v11 = vsel %vm21_vm2, %v87_v10, -inf  ;;  %v428_v12 = vpop.f32.mrb[1].mxu0 }
  0xde   :  { %v98_v13 = vrot.slane %v97_v11, 4  ;;  %v90_v14 = vpop.f32.mrb[2].mxu0 }
  0xdf   :  { %v104_v15 = vsel %vm21_vm2, %v90_v14, -inf  ;;  %v429_v16 = vpop.f32.mrb[3].mxu0 }
  0xe0   :  { %v99_v17 = vmax.f32 %v97_v11, %v98_v13  ;;  %v105_v19 = vrot.slane %v104_v15, 4  ;;  %v313_v16 = vld [vmem:[#allocation4] sm:$0xff] }
  0xe2   :  { %v100_v20 = vrot.slane %v99_v17, 2  ;;  %v106_v21 = vmax.f32 %v104_v15, %v105_v19  ;;  %v315_v15 = vld [vmem:[#allocation4 + $0x10] sm:$0xff]  ;;  %v314_v19 = vld [vmem:[#allocation4 + $0x8] sm:$0xff] }
  0xe4   :  { %v101_v22 = vmax.f32 %v99_v17, %v100_v20  ;;  %v107_v24 = vrot.slane %v106_v21, 2  ;;  %v316_v17 = vld [vmem:[#allocation4 + $0x18] sm:$0xff] }
  0xe6   :  { %v102_v25 = vrot.slane %v101_v22, 1  ;;  %v108_v26 = vmax.f32 %v106_v21, %v107_v24 }
  0xe8   :  { %v103_v28 = vmax.f32 %v101_v22, %v102_v25  ;;  %v109_v30 = vrot.slane %v108_v26, 1 }
  0xea   :  { %v111_v32 = vmax.f32 %v94_v27, %v103_v28  ;;  %v110_v33 = vmax.f32 %v108_v26, %v109_v30 }
  0xec   :  { %v113_v34 = vsub.f32 %v94_v27, %v111_v32  ;;  %v124_v35 = vrot.slane %v111_v32, %v507_v29  ;;  %357 = vst.msk [vmem:[#allocation2] sm:$0x1] %vm16_vm0, %v111_v32  ;;  %v112_v36 = vmax.f32 %v95_v31, %v110_v33  ;;  %v319_v33 = vld [vmem:[#allocation4 + $0x30] sm:$0xff] }
  0xee   :  { %v115_v37 = vmul.f32 1.442695, %v113_v34  ;;  %v131_v38 = vsub.f32 %v87_v10, %v124_v35  ;;  %v114_v39 = vsub.f32 %v95_v31, %v112_v36  ;;  %v128_v40 = vrot.slane %v112_v36, %v507_v29  ;;  %358 = vst.msk [vmem:[#allocation2 + $0x1] sm:$0x1] %vm16_vm0, %v112_v36  ;;  %v317_v34 = vld [vmem:[#allocation4 + $0x20] sm:$0xff]  ;;  %v320_v36 = vld [vmem:[#allocation4 + $0x38] sm:$0xff] }
  0xf0   :  { %450 = vpow2.f32 %v115_v37  ;;  %v133_v41 = vmul.f32 1.442695, %v131_v38  ;;  %v117_v42 = vmul.f32 1.442695, %v114_v39  ;;  %v132_v43 = vsub.f32 %v90_v14, %v128_v40  ;;  %v318_v38 = vld [vmem:[#allocation4 + $0x28] sm:$0xff] }
  0xf2   :  { %452 = vpow2.f32 %v133_v41  ;;  %v135_v44 = vmul.f32 1.442695, %v132_v43 }
  0xf3   :  { %454 = vpow2.f32 %v117_v42 }
  0xf4   :  { %456 = vpow2.f32 %v135_v44 }
  0xfa   :  { %v451_v45 = vpop.eup %450 }
  0xfb   :  { %v326_v47 = vrot.slane %v451_v45, %v507_v29  ;;  %v139_v6 = vmul.f32 %v451_v45, %v137_v2 }
  0xfc   :  { %v453_v48 = vpop.eup %452 }
  0xfd   :  { %v455_v49 = vpop.eup %454  ;;  %v141_v50 = vsel %vm21_vm2, %v453_v48, 0.0  ;;  %v162_v51 = vpack.c.bf16 %v453_v48, %v453_v48  ;;  %v335_v18 = vmul.f32 %v326_v47, %v315_v15  ;;  %v333_v21 = vmul.f32 %v326_v47, %v313_v16 }
  0xfe   :  { %v457_v52 = vpop.eup %456  ;;  %v142_v53 = vrot.slane %v141_v50, 4  ;;  %v519_v57 = vrot.slane %v455_v49, %v507_v29  ;;  %v140_v11 = vmul.f32 %v455_v49, %v138_v5  ;;  %v336_v24 = vmul.f32 %v326_v47, %v316_v17 }
  0xff   :  { %v148_v54 = vsel %vm21_vm2, %v457_v52, 0.0  ;;  %442 = vmatprep.subr.msk.bf16.mxu1 %vm186_vm4, %v162_v51  ;;  %v188_v55 = vsel %vm186_vm4, %v162_v51, 0  ;;  %v163_v56 = vpack.c.bf16 %v457_v52, %v457_v52  ;;  %v334_v28 = vmul.f32 %v326_v47, %v314_v19 }
 0x100   :  { %v143_v58 = vadd.f32 %v142_v53, %v141_v50  ;;  %v149_v59 = vrot.slane %v148_v54, 4  ;;  %431 = vmatpush3.bf16.msra.mxu1 %v188_v55  ;;  %v339_v37 = vmul.f32 %v519_v57, %v319_v33  ;;  %v337_v40 = vmul.f32 %v519_v57, %v317_v34 }
 0x101   :  { %443 = vmatprep.subr.msk.bf16.mxu1 %vm186_vm4, %v163_v56  ;;  %v262_v63 = vsel %vm186_vm4, %v163_v56, 0  ;;  %v340_v44 = vmul.f32 %v519_v57, %v320_v36  ;;  %v338_v48 = vmul.f32 %v519_v57, %v318_v38 }
 0x102   :  { %v144_v61 = vrot.slane %v143_v58, 2  ;;  %v150_v62 = vadd.f32 %v149_v59, %v148_v54 }
 0x103   :  { %433 = vmatmul.mubr.msk.bf16.vlgmr.msra.gmra.mrb[0].mxu1 %vm21_vm2, %v173_v46 }
 0x104   :  { %v145_v0 = vadd.f32 %v144_v61, %v143_v58  ;;  %v151_v1 = vrot.slane %v150_v62, 2  ;;  %437 = vmatpush3.bf16.msra.mxu1 %v262_v63  ;;  %438 = vmatprep.mubr.msk.bf16.mxu1 %vm21_vm2, %v247_v60 }
 0x106   :  { %v146_v3 = vrot.slane %v145_v0, 1  ;;  %v152_v4 = vadd.f32 %v151_v1, %v150_v62 }
 0x108   :  { %v147_v7 = vadd.f32 %v146_v3, %v145_v0  ;;  %v153_v8 = vrot.slane %v152_v4, 1 }
 0x10a   :  { %v155_v10 = vadd.f32 %v147_v7, %v139_v6  ;;  %v154_v12 = vadd.f32 %v153_v8, %v152_v4 }
 0x10b   :  { %439 = vmatmul.mubr.msk.bf16.vlgmr.msra.gmra.mrb[4].mxu1 %vm21_vm2, %v248_v9 }
 0x10c   :  { %158 = vst.msk [vmem:[#allocation3] sm:$0x1] %vm16_vm0, %v155_v10  ;;  %v156_v13 = vadd.f32 %v154_v12, %v140_v11 }
 0x10e   :  { %159 = vst.msk [vmem:[#allocation3 + $0x1] sm:$0x1] %vm16_vm0, %v156_v13 }
 0x113   :  { %v362_v14 = vld [vmem:[#allocation3] sm:$0x1] }
 0x114   :  { %458 = vrcp.f32 %v362_v14 }
 0x115   :  { %v363_v25 = vld [vmem:[#allocation3 + $0x1] sm:$0x1] }
 0x116   :  { %460 = vrcp.f32 %v363_v25 }
 0x11e   :  { %v459_v35 = vpop.eup %458 }
 0x11f   :  { %v379_v41 = vrot.slane %v459_v35, %v507_v29 }
 0x120   :  { %v461_v57 = vpop.eup %460 }
 0x121   :  { %v383_v60 = vrot.slane %v461_v57, %v507_v29 }
 0x1d6   :  { %v434_v20 = vpop.f32.mrb[0].mxu1 }
 0x1d7   :  { %v343_v22 = vadd.f32 %v434_v20, %v335_v18  ;;  %v224_v23 = vpop.f32.mrb[1].mxu1 }
 0x1d8   :  { %v341_v26 = vadd.f32 %v333_v21, %v224_v23  ;;  %v435_v27 = vpop.f32.mrb[2].mxu1 }
 0x1d9   :  { %351 = vst.msk [vmem:[#allocation4 + $0x10] sm:$0xff] %vm21_vm2, %v343_v22  ;;  %v344_v30 = vadd.f32 %v435_v27, %v336_v24  ;;  %v227_v31 = vpop.f32.mrb[3].mxu1 }
 0x1da   :  { %349 = vst.msk [vmem:[#allocation4] sm:$0xff] %vm21_vm2, %v341_v26  ;;  %v342_v32 = vadd.f32 %v334_v28, %v227_v31 }
 0x1db   :  { %352 = vst.msk [vmem:[#allocation4 + $0x18] sm:$0xff] %vm21_vm2, %v344_v30 }
 0x1dc   :  { %350 = vst.msk [vmem:[#allocation4 + $0x8] sm:$0xff] %vm21_vm2, %v342_v32 }
 0x1de   :  { %v440_v39 = vpop.f32.mrb[4].mxu1 }
 0x1df   :  { %v347_v42 = vadd.f32 %v440_v39, %v339_v37  ;;  %v298_v43 = vpop.f32.mrb[5].mxu1 }
 0x1e0   :  { %v368_v45 = vld [vmem:[#allocation4 + $0x10] sm:$0xff]  ;;  %v345_v46 = vadd.f32 %v337_v40, %v298_v43  ;;  %v441_v47 = vpop.f32.mrb[6].mxu1 }
 0x1e1   :  { %v388_v49 = vmul.f32 %v379_v41, %v368_v45  ;;  %v366_v50 = vld [vmem:[#allocation4] sm:$0xff]  ;;  %355 = vst.msk [vmem:[#allocation4 + $0x30] sm:$0xff] %vm21_vm2, %v347_v42  ;;  %v348_v51 = vadd.f32 %v441_v47, %v340_v44  ;;  %v301_v52 = vpop.f32.mrb[7].mxu1 }
 0x1e2   :  { %v386_v53 = vmul.f32 %v379_v41, %v366_v50  ;;  %v369_v54 = vld [vmem:[#allocation4 + $0x18] sm:$0xff]  ;;  %353 = vst.msk [vmem:[#allocation4 + $0x20] sm:$0xff] %vm21_vm2, %v345_v46  ;;  %v346_v55 = vadd.f32 %v338_v48, %v301_v52 }
 0x1e3   :  { %396 = vst.msk [vmem:[%s576_s2 + $0x10] sm:$0xff] %vm21_vm2, %v388_v49  ;;  %v389_v56 = vmul.f32 %v379_v41, %v369_v54  ;;  %v367_v58 = vld [vmem:[#allocation4 + $0x8] sm:$0xff]  ;;  %356 = vst.msk [vmem:[#allocation4 + $0x38] sm:$0xff] %vm21_vm2, %v348_v51 }
 0x1e4   :  { %394 = vst.msk [vmem:[%s576_s2] sm:$0xff] %vm21_vm2, %v386_v53  ;;  %v387_v59 = vmul.f32 %v379_v41, %v367_v58  ;;  %354 = vst.msk [vmem:[#allocation4 + $0x28] sm:$0xff] %vm21_vm2, %v346_v55 }
 0x1e5   :  { %397 = vst.msk [vmem:[%s576_s2 + $0x18] sm:$0xff] %vm21_vm2, %v389_v56 }
 0x1e6   :  { %395 = vst.msk [vmem:[%s576_s2 + $0x8] sm:$0xff] %vm21_vm2, %v387_v59 }
 0x1e8   :  { %v372_v61 = vld [vmem:[#allocation4 + $0x30] sm:$0xff] }
 0x1e9   :  { %v392_v62 = vmul.f32 %v383_v60, %v372_v61  ;;  %v370_v63 = vld [vmem:[#allocation4 + $0x20] sm:$0xff] }
 0x1ea   :  { %v390_v0 = vmul.f32 %v383_v60, %v370_v63  ;;  %v373_v1 = vld [vmem:[#allocation4 + $0x38] sm:$0xff] }
 0x1eb   :  { %400 = vst.msk [vmem:[%s576_s2 + $0x30] sm:$0xff] %vm21_vm2, %v392_v62  ;;  %v393_v2 = vmul.f32 %v383_v60, %v373_v1  ;;  %v371_v3 = vld [vmem:[#allocation4 + $0x28] sm:$0xff] }
 0x1ec   :  { %398 = vst.msk [vmem:[%s576_s2 + $0x20] sm:$0xff] %vm21_vm2, %v390_v0  ;;  %v391_v4 = vmul.f32 %v383_v60, %v371_v3 }
 0x1ed   :  { %401 = vst.msk [vmem:[%s576_s2 + $0x38] sm:$0xff] %vm21_vm2, %v393_v2 }
 0x1ee   :  { %399 = vst.msk [vmem:[%s576_s2 + $0x28] sm:$0xff] %vm21_vm2, %v391_v4 }

</bundles_post_ra>
